<compile_context>
chip_gen: v7x
topology: tpu7x:2x2x1
jax: 0.10.0
libtpu: 0.0.40
codegen_flags: <defaults>
</compile_context>

<pallas_src>
import functools

import jax
import jax.numpy as jnp
from jax.experimental import pallas as pl
from jax.experimental.pallas import tpu as pltpu

LN_EPS = 1e-5  # PyTorch nn.LayerNorm default


def _round_up(x, m):
    return (x + m - 1) // m * m


def _cdiv(a, b):
    return (a + b - 1) // b


def _vmem_budget_bytes():
    """~75% of physical VMEM (96 MiB on v5e/v6e, 48 MiB on v7x's 64 MiB)."""
    cap = 64 * 1024 * 1024  # conservative default (v7x per-core VMEM)
    try:
        info = pltpu.get_tpu_info()
        c = getattr(info, "vmem_capacity_bytes", None)
        if c:
            cap = int(c)
    except Exception:
        pass
    return (cap * 3) // 4


def _choose_k_tiling(in_size, n_pad, w_bytes, budget, max_k_tile=None):
    """Pick (tk, nk). Prefer full K (nk==1) whenever the weight block fits."""
    param_bytes = 2 * 8 * n_pad * 4
    full_fixed = 2 * in_size * n_pad * w_bytes
    if (max_k_tile is None or in_size <= max_k_tile) and (
        full_fixed + param_bytes <= budget // 2
    ):
        return in_size, 1
    # Tiled K: tk must be a multiple of 128 (lane dim of x / sublane dim of W).
    tk_cap = max(128, ((budget // 3) // (2 * n_pad * w_bytes)) // 128 * 128)
    if max_k_tile is not None:
        tk_cap = min(tk_cap, max(128, (max_k_tile // 128) * 128))
    nk = _cdiv(in_size, tk_cap)
    tk = _round_up(_cdiv(in_size, nk), 128)   # minimize K padding
    nk = _cdiv(in_size, tk)
    return tk, nk


def _choose_batch_tiling(B, tk, n_pad, nk, x_bytes, w_bytes, out_bytes, budget, sub):
    """Pick (tb, nb): as large as the VMEM budget allows, minimal pad waste."""
    fixed = 2 * tk * n_pad * w_bytes + 2 * 8 * n_pad * 4          # W + packed params
    per_row = 2 * tk * x_bytes + 2 * n_pad * out_bytes            # x + out (double-buffered)
    if nk > 1:
        per_row += n_pad * 4                                      # f32 accumulator scratch
    avail = max(budget - fixed, per_row * sub)
    tb_cap = max(sub, (avail // per_row) // sub * sub)
    tb_cap = min(tb_cap, _round_up(B, sub), 4096)
    nb = _cdiv(B, tb_cap)
    # v7x megacore: ensure >= 2 batch tiles for large batches so the "parallel"
    # grid axis can span both TensorCores (negligible cost on v5e/v6e here).
    if nb == 1 and B >= 1024:
        nb = 2
    tb = _round_up(_cdiv(B, nb), sub)
    nb = _cdiv(B, tb)
    return tb, nb


def _ln_relu_epilogue(acc, p_ref, o_ref, *, inv_n, pad_lanes):
    """bias + ReLU + LayerNorm on the f32 accumulator, lane-dense store."""
    bias = p_ref[0:1, :]
    gamma = p_ref[1:2, :]
    beta = p_ref[2:3, :]
    y = jnp.maximum(acc + bias, 0.0)
    # Padded lanes of y are exactly zero (zero W columns / zero bias), so the
    # sum over n_pad lanes divided by the true out_size is the exact mean.
    mu = jnp.sum(y, axis=-1, keepdims=True) * inv_n
    d = y - mu
    ss = jnp.sum(d * d, axis=-1, keepdims=True)
    if pad_lanes:
        # Padded lanes contribute (-mu)^2 each to ss; remove them exactly.
        ss = ss - float(pad_lanes) * (mu * mu)
    inv_std = jax.lax.rsqrt(ss * inv_n + LN_EPS)
    o_ref[...] = (d * inv_std * gamma + beta).astype(o_ref.dtype)


def _fused_kernel_single_k(x_ref, w_ref, p_ref, o_ref, *, inv_n, pad_lanes):
    """nk == 1: no accumulator scratch; matmul result feeds the epilogue."""
    acc = jnp.dot(x_ref[...], w_ref[...], preferred_element_type=jnp.float32)
    _ln_relu_epilogue(acc, p_ref, o_ref, inv_n=inv_n, pad_lanes=pad_lanes)


def _fused_kernel_multi_k(x_ref, w_ref, p_ref, o_ref, acc_ref, *, inv_n, pad_lanes):
    """nk > 1: no zero-init, no final store/reload of the accumulator."""
    k = pl.program_id(1)
    last = pl.num_programs(1) - 1
    partial = jnp.dot(x_ref[...], w_ref[...], preferred_element_type=jnp.float32)

    @pl.when(k == 0)
    def _():
        acc_ref[...] = partial

    @pl.when((k > 0) & (k < last))
    def _():
        acc_ref[...] += partial

    @pl.when(k == last)  # last >= 1 in this kernel variant
    def _():
        _ln_relu_epilogue(acc_ref[...] + partial, p_ref, o_ref,
                          inv_n=inv_n, pad_lanes=pad_lanes)


def _forward(x, weight_t_p, params, out_size, tk, nk, budget, out_dtype):
    B, in_size = x.shape
    k_pad, n_pad = weight_t_p.shape

    x_bytes = jnp.dtype(x.dtype).itemsize
    w_bytes = jnp.dtype(weight_t_p.dtype).itemsize
    out_bytes = jnp.dtype(out_dtype).itemsize
    # Sublane packing multiple: 8 for 4-byte, 16 for 2-byte, 32 for 1-byte.
    sub = 8 if x_bytes >= 4 else (16 if x_bytes == 2 else 32)

    tb, nb = _choose_batch_tiling(B, tk, n_pad, nk, x_bytes, w_bytes,
                                  out_bytes, budget, sub)
    b_pad = tb * nb

    # Only x may need per-call padding (batch rows; K only when nk > 1).
    x_p = x
    if (b_pad, k_pad) != (B, in_size):
        x_p = jnp.zeros((b_pad, k_pad), x.dtype).at[:B, :in_size].set(x)

    inv_n = 1.0 / float(out_size)
    pad_lanes = n_pad - out_size

    cost = pl.CostEstimate(
        flops=2 * b_pad * k_pad * n_pad,
        transcendentals=b_pad,  # one rsqrt per row
        bytes_accessed=(b_pad * k_pad * x_bytes
                        + nb * k_pad * n_pad * w_bytes   # W streamed per batch tile
                        + b_pad * n_pad * out_bytes      # output write
                        + 3 * n_pad * 4),
    )

    if nk == 1:
        kernel = functools.partial(_fused_kernel_single_k,
                                   inv_n=inv_n, pad_lanes=pad_lanes)
        grid_spec = pltpu.PrefetchScalarGridSpec(
            num_scalar_prefetch=0,
            grid=(nb,),
            in_specs=[
                pl.BlockSpec((tb, k_pad), lambda i: (i, 0)),     # x tile
                pl.BlockSpec((k_pad, n_pad), lambda i: (0, 0)),  # W (resident)
                pl.BlockSpec((3, n_pad), lambda i: (0, 0)),      # bias/gamma/beta
            ],
            out_specs=pl.BlockSpec((tb, n_pad), lambda i: (i, 0)),
            scratch_shapes=[],
        )
        dim_sem = ("parallel",)
    else:
        kernel = functools.partial(_fused_kernel_multi_k,
                                   inv_n=inv_n, pad_lanes=pad_lanes)
        grid_spec = pltpu.PrefetchScalarGridSpec(
            num_scalar_prefetch=0,
            grid=(nb, nk),
            in_specs=[
                pl.BlockSpec((tb, tk), lambda i, k: (i, k)),      # x tile
                pl.BlockSpec((tk, n_pad), lambda i, k: (k, 0)),   # W tile
                pl.BlockSpec((3, n_pad), lambda i, k: (0, 0)),    # bias/gamma/beta
            ],
            out_specs=pl.BlockSpec((tb, n_pad), lambda i, k: (i, 0)),
            scratch_shapes=[pltpu.VMEM((tb, n_pad), jnp.float32)],
        )
        dim_sem = ("parallel", "arbitrary")

    out_p = pl.pallas_call(
        kernel,
        out_shape=jax.ShapeDtypeStruct((b_pad, n_pad), out_dtype),
        grid_spec=grid_spec,
        compiler_params=pltpu.CompilerParams(
            dimension_semantics=dim_sem,
            vmem_limit_bytes=int(budget),
        ),
        cost_estimate=cost,
    )(x_p, weight_t_p, params)

    if (b_pad, n_pad) != (B, out_size):
        out_p = out_p[:B, :out_size]
    return out_p


class EarlyExitLinLayer:
    """Pallas-TPU equivalent of Early_exit_lin_layer: LayerNorm(ReLU(Linear(x)))."""

    def __init__(self, weight, bias, ln_weight, ln_bias, *,
                 compute_dtype=None, max_k_tile=None):
        # weight: [out_size, in_size] (PyTorch nn.Linear layout)
        out_size, in_size = weight.shape
        self.in_size = int(in_size)
        self.out_size = int(out_size)
        self.n_pad = _round_up(self.out_size, 128)
        self._budget = _vmem_budget_bytes()
        self._compute_dtype = compute_dtype

        # Optional bf16 MXU operands (v6e/v7x fast path); f32 accumulation kept.
        w = weight.astype(compute_dtype) if compute_dtype is not None else weight
        w_bytes = jnp.dtype(w.dtype).itemsize

        self.tk, self.nk = _choose_k_tiling(self.in_size, self.n_pad, w_bytes,
                                            self._budget, max_k_tile)
        k_pad = self.in_size if self.nk == 1 else self.tk * self.nk

        # Pre-transpose + zero-pad the weight ONCE (hoisted out of per-call path).
        w_t = jnp.transpose(w)  # [in_size, out_size]
        if (k_pad, self.n_pad) != (self.in_size, self.out_size):
            w_t = jnp.zeros((k_pad, self.n_pad), w_t.dtype).at[
                :self.in_size, :self.out_size].set(w_t)
        self.weight_t = w_t

        # bias / gamma / beta packed into a single resident (3, n_pad) f32 block.
        params = jnp.zeros((3, self.n_pad), jnp.float32)
        params = params.at[0, :self.out_size].set(bias.astype(jnp.float32))
        params = params.at[1, :self.out_size].set(ln_weight.astype(jnp.float32))
        params = params.at[2, :self.out_size].set(ln_bias.astype(jnp.float32))
        self.params = params

    def __call__(self, x):
        out_dtype = x.dtype
        if self._compute_dtype is not None:
            x = x.astype(self._compute_dtype)
        return _forward(x, self.weight_t, self.params, self.out_size,
                        self.tk, self.nk, self._budget, out_dtype)


def _reference(x, weight, bias, gamma, beta):
    y = jnp.maximum(x @ weight.T + bias, 0.0)
    mu = jnp.mean(y, axis=-1, keepdims=True)
    var = jnp.mean((y - mu) ** 2, axis=-1, keepdims=True)
    return (y - mu) / jnp.sqrt(var + LN_EPS) * gamma + beta


if __name__ == "__main__":
    IN_SIZE, OUT_SIZE = 32, 32

    key = jax.random.PRNGKey(0)
    kx, kw, kb, kx2, kw2, kx3 = jax.random.split(key, 6)

    # Deterministic PyTorch-like init (nn.Linear uniform bound).
    bound = 1.0 / (IN_SIZE ** 0.5)
    weight = jax.random.uniform(kw, (OUT_SIZE, IN_SIZE), jnp.float32, -bound, bound)
    bias = jax.random.uniform(kb, (OUT_SIZE,), jnp.float32, -bound, bound)
    gamma = jnp.ones((OUT_SIZE,), jnp.float32)    # LayerNorm weight init
    beta = jnp.zeros((OUT_SIZE,), jnp.float32)    # LayerNorm bias init

    layer = EarlyExitLinLayer(weight, bias, gamma, beta)

    # Case 1: aligned batch (no padding anywhere, single-K fast path).
    x1 = jax.random.normal(kx, (8, IN_SIZE), dtype=jnp.float32)
    out1 = jax.block_until_ready(layer(x1))
    ref1 = _reference(x1, weight, bias, gamma, beta)
    assert out1.shape == ref1.shape
    assert jnp.allclose(out1, ref1, atol=3e-5, rtol=3e-5), "mismatch (case 1)"

    # Case 2: ragged batch (exercises batch padding + output slicing).
    x2 = jax.random.normal(kx2, (20, IN_SIZE), dtype=jnp.float32)
    out2 = jax.block_until_ready(layer(x2))
    ref2 = _reference(x2, weight, bias, gamma, beta)
    assert out2.shape == ref2.shape
    assert jnp.allclose(out2, ref2, atol=3e-5, rtol=3e-5), "mismatch (case 2)"

    # Case 3: forced multi-step K reduction (exercises the accumulator kernel).
    IN2, OUT2 = 384, 48
    bound2 = 1.0 / (IN2 ** 0.5)
    weight2 = jax.random.uniform(kw2, (OUT2, IN2), jnp.float32, -bound2, bound2)
    bias2 = jax.random.uniform(kb, (OUT2,), jnp.float32, -bound2, bound2)
    gamma2 = jnp.ones((OUT2,), jnp.float32)
    beta2 = jnp.zeros((OUT2,), jnp.float32)
    layer2 = EarlyExitLinLayer(weight2, bias2, gamma2, beta2, max_k_tile=128)
    assert layer2.nk > 1, "expected multi-K path in case 3"
    x3 = jax.random.normal(kx3, (24, IN2), dtype=jnp.float32)
    out3 = jax.block_until_ready(layer2(x3))
    ref3 = _reference(x3, weight2, bias2, gamma2, beta2)
    assert out3.shape == ref3.shape
    assert jnp.allclose(out3, ref3, atol=1e-3, rtol=1e-3), "mismatch (case 3)"

    print("KERNEL_OK")
</pallas_src>

<mosaic_0001>
module attributes {stable_mosaic.version = 11 : i64} {
  func.func @_fused_kernel_single_k(%arg0: i32, %arg1: memref<8x32xf32, #tpu.memory_space<vmem>>, %arg2: memref<32x128xf32, #tpu.memory_space<vmem>>, %arg3: memref<3x128xf32, #tpu.memory_space<vmem>>, %arg4: memref<8x128xf32, #tpu.memory_space<vmem>>) attributes {dimension_semantics = [#tpu.dimension_semantics<parallel>], iteration_bounds = array<i64: 1>, scalar_prefetch = 0 : i64, scratch_operands = 0 : i64, tpu.core_type = #tpu.core_type<tc>, window_params = [{transform_indices = @transform_0, window_bounds = array<i64: 8, 32>}, {pipeline_mode = #tpu.pipeline_mode<synchronous>, transform_indices = @transform_1, window_bounds = array<i64: 32, 128>}, {pipeline_mode = #tpu.pipeline_mode<synchronous>, transform_indices = @transform_2, window_bounds = array<i64: 3, 128>}, {transform_indices = @transform_3, window_bounds = array<i64: 8, 128>}]} {
    %c0 = arith.constant 0 : index
    %c0_0 = arith.constant 0 : index
    %0 = vector.load %arg1[%c0, %c0_0] : memref<8x32xf32, #tpu.memory_space<vmem>>, vector<8x32xf32>
    %c0_1 = arith.constant 0 : index
    %c0_2 = arith.constant 0 : index
    %1 = vector.load %arg2[%c0_1, %c0_2] : memref<32x128xf32, #tpu.memory_space<vmem>>, vector<32x128xf32>
    %cst = arith.constant dense<0.000000e+00> : vector<8x128xf32>
    %2 = tpu.matmul %0, %1, %cst {dimension_numbers = #tpu.dot_dimension_numbers<[1], [0], [0], [1], [0, 0, 1, 1], [], []>} : vector<8x32xf32>, vector<32x128xf32>, vector<8x128xf32> -> vector<8x128xf32>
    %c0_3 = arith.constant 0 : index
    %c0_4 = arith.constant 0 : index
    %3 = vector.load %arg3[%c0_3, %c0_4] : memref<3x128xf32, #tpu.memory_space<vmem>>, vector<1x128xf32>
    %c1 = arith.constant 1 : index
    %c0_5 = arith.constant 0 : index
    %4 = vector.load %arg3[%c1, %c0_5] : memref<3x128xf32, #tpu.memory_space<vmem>>, vector<1x128xf32>
    %c2 = arith.constant 2 : index
    %c0_6 = arith.constant 0 : index
    %5 = vector.load %arg3[%c2, %c0_6] : memref<3x128xf32, #tpu.memory_space<vmem>>, vector<1x128xf32>
    %6 = vector.broadcast %3 : vector<1x128xf32> to vector<8x128xf32>
    %7 = arith.addf %2, %6 : vector<8x128xf32>
    %cst_7 = arith.constant 0.000000e+00 : f32
    %8 = vector.broadcast %cst_7 : f32 to vector<8x128xf32>
    %9 = arith.maximumf %7, %8 : vector<8x128xf32>
    %cst_8 = arith.constant dense<0.000000e+00> : vector<8xf32>
    %10 = vector.multi_reduction <add>, %9, %cst_8 [1] : vector<8x128xf32> to vector<8xf32>
    %11 = vector.shape_cast %10 : vector<8xf32> to vector<8x1xf32>
    %cst_9 = arith.constant 3.125000e-02 : f32
    %12 = vector.broadcast %cst_9 : f32 to vector<8x1xf32>
    %13 = arith.mulf %11, %12 : vector<8x1xf32>
    %14 = vector.broadcast %13 : vector<8x1xf32> to vector<8x128xf32>
    %15 = arith.subf %9, %14 : vector<8x128xf32>
    %16 = arith.mulf %15, %15 : vector<8x128xf32>
    %cst_10 = arith.constant dense<0.000000e+00> : vector<8xf32>
    %17 = vector.multi_reduction <add>, %16, %cst_10 [1] : vector<8x128xf32> to vector<8xf32>
    %18 = vector.shape_cast %17 : vector<8xf32> to vector<8x1xf32>
    %19 = arith.mulf %13, %13 : vector<8x1xf32>
    %cst_11 = arith.constant 9.600000e+01 : f32
    %20 = vector.broadcast %cst_11 : f32 to vector<8x1xf32>
    %21 = arith.mulf %20, %19 : vector<8x1xf32>
    %22 = arith.subf %18, %21 : vector<8x1xf32>
    %cst_12 = arith.constant 3.125000e-02 : f32
    %23 = vector.broadcast %cst_12 : f32 to vector<8x1xf32>
    %24 = arith.mulf %22, %23 : vector<8x1xf32>
    %cst_13 = arith.constant 9.99999974E-6 : f32
    %25 = vector.broadcast %cst_13 : f32 to vector<8x1xf32>
    %26 = arith.addf %24, %25 : vector<8x1xf32>
    %27 = math.rsqrt %26 : vector<8x1xf32>
    %28 = vector.broadcast %27 : vector<8x1xf32> to vector<8x128xf32>
    %29 = arith.mulf %15, %28 : vector<8x128xf32>
    %30 = vector.broadcast %4 : vector<1x128xf32> to vector<8x128xf32>
    %31 = arith.mulf %29, %30 : vector<8x128xf32>
    %32 = vector.broadcast %5 : vector<1x128xf32> to vector<8x128xf32>
    %33 = arith.addf %31, %32 : vector<8x128xf32>
    %c0_14 = arith.constant 0 : index
    %c0_15 = arith.constant 0 : index
    %34 = vector.load %arg4[%c0_14, %c0_15] : memref<8x128xf32, #tpu.memory_space<vmem>>, vector<8x128xf32>
    tpu.vector_store %arg4[%c0_14, %c0_15], %33 {strides = array<i32>} : memref<8x128xf32, #tpu.memory_space<vmem>>, vector<8x128xf32>,
    return
  }
  func.func @transform_0(%arg0: i32) -> (i32, i32) {
    %c0_i32 = arith.constant 0 : i32
    %c0_i32_0 = arith.constant 0 : i32
    return %arg0, %c0_i32 : i32, i32
  }
  func.func @transform_1(%arg0: i32) -> (i32, i32) {
    %c0_i32 = arith.constant 0 : i32
    %c0_i32_0 = arith.constant 0 : i32
    %c0_i32_1 = arith.constant 0 : i32
    return %c0_i32, %c0_i32_0 : i32, i32
  }
  func.func @transform_2(%arg0: i32) -> (i32, i32) {
    %c0_i32 = arith.constant 0 : i32
    %c0_i32_0 = arith.constant 0 : i32
    %c0_i32_1 = arith.constant 0 : i32
    return %c0_i32, %c0_i32_0 : i32, i32
  }
  func.func @transform_3(%arg0: i32) -> (i32, i32) {
    %c0_i32 = arith.constant 0 : i32
    %c0_i32_0 = arith.constant 0 : i32
    return %arg0, %c0_i32 : i32, i32
  }
}

</mosaic_0001>

<bundles_post_ra>
// kernel: tpu_custom_call.1
= control target key start
LH: loop header
LB: loop body
LE: loop exit
PB: predicated region body
PF: predicated region fallthrough
CT: control target
= control target key end

     0   :  { %8 = vsyncpa [#allocation3], 0  ;;  %s357_s0 = inlined_call_operand.hbm [shape: f32[8,32], index: 0, kind: input, shape index: {}]   ;;  %s358_s1 = inlined_call_operand.hbm [shape: f32[32,128], index: 1, kind: input, shape index: {}]   ;;  %s359_s2 = inlined_call_operand.vmem [shape: f32[3,128], index: 2, kind: input, shape index: {}]   ;;  %s360_s3 = inlined_call_operand.hbm [shape: f32[8,128], index: 3, kind: output, shape index: {}]  }
   0x1   :  { %9 = vsyncpa [#allocation6], 0 }
   0x2   :  { %10 = vsyncpa [#allocation4], 0  ;;  %s277_s12 = smov [#allocation2]   ;;  %s278_s14 = smov [#allocation5]  }
   0x3   :  { %s17_s13 = sshll.u32 %s277_s12, 4  ;;  %s26_s15 = sshll.u32 %s278_s14, 4  ;;  %s18_s13 = int_to_ptr.vmem [resolvable:$true] %s17_s13  ;;  %s305_s15 = int_to_ptr.vmem [resolvable:$true] %s26_s15 }
   0x4   :  { %s205_s18 = scalar_lea.hbm %s357_s0, 128 }
   0x5   :  { %p206_p0 = scmp.ne.s32.totalorder %s357_s0, %s205_s18  ;;  %p209_p1 = scmp.lt.u32.totalorder %s205_s18, %s357_s0 }
   0x7   :  { %p211_p2 = pnand %p209_p1, %p206_p0 }
   0x9   :  { %214 = shalt.err (!%p211_p2)
}
   0xa   :  { %s215_s23 = scalar_lea.vmem %s18_s13, 128  ;;  %p220_p4 = scmp.lt.s32.totalorder %s18_s13, %s18_s13 }
   0xb   :  { %p216_p3 = scmp.ne.s32.totalorder %s18_s13, %s215_s23  ;;  %p221_p5 = scmp.lt.s32.totalorder %s215_s23, %s215_s23 }
   0xd   :  { %p222_p6 = por %p221_p5, %p220_p4 }
   0xf   :  { %p223_p7 = pnand %p222_p6, %p216_p3 }
  0x11   :  { %226 = shalt.err (!%p223_p7)
}
  0x12   :  { %20 = dma.hbm_to_vmem [thread:$0]  %s357_s0, 128, %s18_s13, [#allocation3]  }
  0x13   :  { %s227_s28 = scalar_lea.hbm %s358_s1, 512 }
  0x14   :  { %p228_p8 = scmp.ne.s32.totalorder %s358_s1, %s227_s28  ;;  %p231_p9 = scmp.lt.u32.totalorder %s227_s28, %s358_s1 }
  0x16   :  { %p233_p10 = pnand %p231_p9, %p228_p8 }
  0x18   :  { %236 = shalt.err (!%p233_p10)
}
  0x19   :  { %s237_s6 = scalar_lea.vmem %s305_s15, 512  ;;  %p242_p12 = scmp.lt.s32.totalorder %s305_s15, %s305_s15 }
  0x1a   :  { %p238_p11 = scmp.ne.s32.totalorder %s305_s15, %s237_s6  ;;  %p243_p13 = scmp.lt.s32.totalorder %s237_s6, %s237_s6 }
  0x1c   :  { %p244_p0 = por %p243_p13, %p242_p12 }
  0x1e   :  { %p245_p1 = pnand %p244_p0, %p238_p11 }
  0x20   :  { %248 = shalt.err (!%p245_p1)
}
  0x21   :  { %s279_s0 = smov 128   ;;  %s280_s7 = smov 8  }
  0x22   :  { %32 = dma.hbm_to_vmem [thread:$0]  %s358_s1, 512, %s305_s15, [#allocation6], %s279_s0, %s279_s0, %s280_s7  }
  0x23   :  { %271 = dma.done.wait [#allocation3], 128  }
  0x24   :  { %272 = vsyncadd [#allocation3], 4294967168 }
  0x25   :  { %273 = dma.done.wait [#allocation6], 512  }
  0x26   :  { %274 = vsyncadd [#allocation6], 4294966784  ;;  %v281_v0 = vmov 0.0|0.0   ;;  %vm282_vm0 = vmmov 0   ;;  %v283_v1 = vmov 0.0   ;;  %v42_v2 = vld [vmem:[#allocation5] sm:$0xff] }
  0x27   :  { %189 = vmatprep.subr.bf16.mxu0 %v281_v0  ;;  %186 = vmatprep.mubr.msk.f32.mxu0 %vm282_vm0, %v283_v1  ;;  %v43_v3 = vld [vmem:[#allocation5 + $0x8] sm:$0xff]  ;;  %v44_v4 = vld [vmem:[#allocation5 + $0x10] sm:$0xff]  ;;  %v45_v6 = vld [vmem:[#allocation5 + $0x18] sm:$0xff]  ;;  %vm53_vm1 = vcmask 261120   ;;  %s284_s15 = smov [#allocation7]  }
  0x28   :  { %v190_v5 = vpack.c.bf16 %v43_v3, %v42_v2  ;;  %v193_v7 = vpack.c.bf16 %v45_v6, %v44_v4  ;;  %v41_v8 = vld [vmem:[#allocation2] sm:$0xff]  ;;  %s159_s16 = sshll.u32 %s284_s15, 4  ;;  %s160_s16 = int_to_ptr.vmem [resolvable:$true] %s159_s16 }
  0x29   :  { %v169_v9 = vld [vmem:[%s359_s2] ss:$0 sm:$0xff]  ;;  %v171_v25 = vld [vmem:[%s359_s2 + $0x1] ss:$0 sm:$0xff]  ;;  %v172_v27 = vld [vmem:[%s359_s2 + $0x2] ss:$0 sm:$0xff]  ;;  %p254_p3 = scmp.lt.s32.totalorder %s160_s16, %s160_s16 }
  0x2a   :  { %191 = vmatpush3.bf16.msra.mxu0 %v190_v5  ;;  %s249_s17 = scalar_lea.vmem %s160_s16, 128 }
  0x2b   :  { %192 = vmatprep.subr.bf16.mxu0 %v281_v0  ;;  %p250_p2 = scmp.ne.s32.totalorder %s160_s16, %s249_s17  ;;  %p255_p4 = scmp.lt.s32.totalorder %s249_s17, %s249_s17 }
  0x2d   :  { %p256_p5 = por %p255_p4, %p254_p3 }
  0x2e   :  { %194 = vmatpush3.bf16.msra.mxu0 %v193_v7 }
  0x2f   :  { %p257_p6 = pnand %p256_p5, %p250_p2 }
  0x31   :  { %187 = vmatmul.mubr.msk.f32.vlgmr.msra.gmra.mrb[0].mxu0 %vm53_vm1, %v41_v8 }
 0x104   :  { %v123_v10 = vpop.f32.mrb[0].mxu0 }
 0x105   :  { %v124_v11 = vadd.f32 %v169_v9, %v123_v10  ;;  %v188_v12 = vpop.f32.mrb[1].mxu0 }
 0x107   :  { %v127_v13 = vmax.f32 %v124_v11, 0.0 }
 0x109   :  { %128 = vadd.xlane.f32.xlu0 %v127_v13 }
 0x196   :  { %v129_v14 = vpop.xlane.xlu0 %128 }
 0x197   :  { %v130_v15 = vmul.f32 0.03125, %v129_v14 }
 0x199   :  { %v131_v16 = vsub.f32 %v127_v13, %v130_v15  ;;  %v135_v18 = vmul.f32 %v130_v15, %v130_v15 }
 0x19b   :  { %v132_v17 = vmul.f32 %v131_v16, %v131_v16  ;;  %v136_v19 = vmul.f32 96.0, %v135_v18 }
 0x19d   :  { %133 = vadd.xlane.f32.xlu0 %v132_v17 }
 0x22a   :  { %v134_v20 = vpop.xlane.xlu0 %133 }
 0x22b   :  { %v137_v21 = vsub.f32 %v134_v20, %v136_v19 }
 0x22d   :  { %v138_v22 = vmul.f32 0.03125, %v137_v21 }
 0x22f   :  { %v139_v23 = vadd.f32 1e-05, %v138_v22 }
 0x231   :  { %203 = vrsqrt.f32 %v139_v23 }
 0x23b   :  { %v204_v24 = vpop.eup %203 }
 0x23c   :  { %v141_v26 = vmul.f32 %v204_v24, %v131_v16 }
 0x23e   :  { %v146_v28 = vmul.f32 %v171_v25, %v141_v26 }
 0x240   :  { %v151_v29 = vadd.f32 %v172_v27, %v146_v28 }
 0x242   :  { %152 = vst [vmem:[#allocation7] sm:$0xff] %v151_v29 }
 0x243   :  { %260 = shalt.err (!%p257_p6)
}
 0x244   :  { %s261_s20 = scalar_lea.hbm %s360_s3, 128 }
 0x245   :  { %p262_p7 = scmp.ne.s32.totalorder %s360_s3, %s261_s20  ;;  %p265_p8 = scmp.lt.u32.totalorder %s261_s20, %s360_s3 }
 0x247   :  { %p267_p9 = pnand %p265_p8, %p262_p7 }
 0x249   :  { %270 = shalt.err (!%p267_p9)
}
 0x24a   :  { %162 = dma.vmem_to_hbm [thread:$0]  %s160_s16, 128, %s360_s3, [#allocation4]  }
 0x24b   :  { %275 = dma.done.wait [#allocation4], 128  }
 0x24c   :  { %276 = vsyncadd [#allocation4], 4294967168 }
 0x24d   :  { %166 = vsyncpa [#allocation3], 1 }
 0x24e   :  { %167 = vsyncpa [#allocation6], 1 }
 0x24f   :  { %168 = vsyncpa [#allocation4], 1 }

</bundles_post_ra>
